<compile_context>
chip_gen: v7x
topology: tpu7x:2x2x1
jax: 0.10.0
libtpu: 0.0.40
codegen_flags: <defaults>
</compile_context>

<pallas_src>
import functools

import jax
import jax.numpy as jnp
from jax import lax
from jax.experimental import pallas as pl
from jax.experimental.pallas import tpu as pltpu

_EPS = 1e-5


def _relu_dwconv_bn_kernel(x_ref, w_ref, g_ref, b_ref, o_ref, acc_ref):
    # x_ref  : (B, H, W)  one channel's activations, input dtype      (VMEM)
    # w_ref  : (C, 9)     depthwise taps, row-major (u*3 + v), f32    (SMEM)
    # g_ref  : (C,)       BatchNorm gamma, f32                        (SMEM)
    # b_ref  : (C,)       BatchNorm beta, f32                         (SMEM)
    # o_ref  : (B, H, W)  output, input dtype                         (VMEM)
    # acc_ref: (B, H, W)  f32 conv accumulator                        (VMEM scratch)
    B, H, W = acc_ref.shape
    c = pl.program_id(0)

    # Hoist the nine scalar taps (cheap SMEM scalar loads, outside the loop).
    taps = [[w_ref[c, u * 3 + v] for v in range(3)] for u in range(3)]

    # Depthwise 3x3, stride 1, padding 1.  The column (dx / lane-axis) shifts are
    # hoisted: each column-shifted window is ReLU'd + upcast once and reused for
    # the three row (dy) taps.  Out-of-range halo contributions are skipped by
    # accumulating into the matching sub-window of acc_ref, so no padded slab is
    # ever built and no border masks are needed.
    first = True
    for v in (1, 0, 2):                              # column offset ox = v - 1
        ox = v - 1
        cs0, cs1 = max(0, ox), W + min(0, ox)        # source columns
        cd0, cd1 = max(0, -ox), W + min(0, -ox)      # destination columns
        xs = jnp.maximum(x_ref[:, :, cs0:cs1].astype(jnp.float32), 0.0)
        for u in ((1, 0, 2) if v == 1 else (0, 1, 2)):   # row offset oy = u - 1
            oy = u - 1
            rs0, rs1 = max(0, oy), H + min(0, oy)    # source rows
            rd0, rd1 = max(0, -oy), H + min(0, -oy)  # destination rows
            contrib = xs[:, rs0:rs1, :] * taps[u][v]
            if first:
                # Center tap (oy, ox) == (0, 0) covers the full window, so this
                # assignment also initializes the accumulator (no zero-fill pass).
                acc_ref[...] = contrib
                first = False
            else:
                acc_ref[:, rd0:rd1, cd0:cd1] += contrib

    # BatchNorm2d, training-mode batch statistics for this channel:
    # per-channel mean / biased variance over (B, H, W), eps = 1e-5, affine.
    # Mean-shifted two-pass variance avoids E[x^2]-mean^2 cancellation.
    y = acc_ref[...]
    inv_n = 1.0 / float(B * H * W)
    mean = jnp.sum(y, keepdims=True) * inv_n          # (1, 1, 1)
    d = y - mean
    var = jnp.sum(d * d, keepdims=True) * inv_n       # (1, 1, 1)
    scale = g_ref[c] * lax.rsqrt(var + _EPS)          # (1, 1, 1)
    o_ref[...] = (d * scale + b_ref[c]).astype(o_ref.dtype)


@functools.partial(jax.jit, static_argnames=("stride",))
def alt_depthwise_separable_conv(x, weight, gamma, beta, stride=1):
    """ReLU -> Conv2d(C, C, 3, stride=1, padding=1, groups=C, bias=False) -> BN(C).

    x: (B, C, H, W), weight: (C, 1, 3, 3), gamma/beta: (C,).  Returns (B, C, H, W).
    """
    assert stride == 1, "kernel specialized to the module default stride=1"
    B, C, H, W = x.shape
    assert weight.shape == (C, 1, 3, 3)

    # Tiny parameter tensors -> SMEM; reshape of a contiguous array is free.
    w9 = weight.reshape(C, 9).astype(jnp.float32)
    g = gamma.reshape(C).astype(jnp.float32)
    b = beta.reshape(C).astype(jnp.float32)

    # Per-step VMEM footprint: double-buffered (in + out) channel slabs plus the
    # f32 accumulator scratch.  Capped at 48 MiB so the limit is safe on v7x
    # (64 MiB VMEM); on v5e/v6e (128 MiB) this could be raised for larger slabs.
    blk = B * H * W
    need = 2 * 2 * blk * x.dtype.itemsize + blk * 4
    vmem_limit = int(min(max(4 * need, 32 * 1024 * 1024), 48 * 1024 * 1024))

    chan_spec = pl.BlockSpec((B, None, H, W), lambda c: (0, c, 0, 0))
    smem_spec = pl.BlockSpec(memory_space=pltpu.MemorySpace.SMEM)

    return pl.pallas_call(
        _relu_dwconv_bn_kernel,
        out_shape=jax.ShapeDtypeStruct((B, C, H, W), x.dtype),
        grid=(C,),
        in_specs=[chan_spec, smem_spec, smem_spec, smem_spec],
        out_specs=chan_spec,
        scratch_shapes=[pltpu.VMEM((B, H, W), jnp.float32)],
        compiler_params=pltpu.CompilerParams(
            dimension_semantics=("parallel",),
            vmem_limit_bytes=vmem_limit,
        ),
    )(x, w9, g, b)


def _reference(x, weight, gamma, beta, eps=_EPS):
    """Pure-JAX reference: ReLU -> depthwise 3x3 conv (pad=1) -> BN (train, affine)."""
    C = x.shape[1]
    r = jnp.maximum(x, 0.0)
    y = lax.conv_general_dilated(
        r, weight, window_strides=(1, 1), padding=((1, 1), (1, 1)),
        dimension_numbers=("NCHW", "OIHW", "NCHW"), feature_group_count=C)
    mean = jnp.mean(y, axis=(0, 2, 3), keepdims=True)
    var = jnp.mean((y - mean) ** 2, axis=(0, 2, 3), keepdims=True)
    yhat = (y - mean) * lax.rsqrt(var + eps)
    return yhat * gamma[None, :, None, None] + beta[None, :, None, None]


if __name__ == "__main__":
    key = jax.random.PRNGKey(0)
    kx, kw, kg, kb = jax.random.split(key, 4)
    B, C, H, W = 2, 4, 16, 16

    x = jax.random.normal(kx, (B, C, H, W), dtype=jnp.float32)
    weight = jax.random.normal(kw, (C, 1, 3, 3), dtype=jnp.float32) * 0.2
    gamma = 1.0 + 0.1 * jax.random.normal(kg, (C,), dtype=jnp.float32)
    beta = 0.05 * jax.random.normal(kb, (C,), dtype=jnp.float32)

    out = jax.block_until_ready(alt_depthwise_separable_conv(x, weight, gamma, beta))

    # TODO(synk): the module's first-forward energy()/MAC bookkeeping (ptflops +
    # pandas host-side accounting) is pure Python side effects, not tensor
    # compute, and is intentionally not translated.
    # TODO(synk): PyTorch BatchNorm2d training mode also updates running_mean /
    # running_var (module state); the kernel only produces the normalized output.

    ref = _reference(x, weight, gamma, beta)
    assert out.shape == (B, C, H, W)
    err = float(jnp.max(jnp.abs(out - ref)))
    assert err < 2e-4, f"mismatch vs reference: max abs err = {err}"
    print("KERNEL_OK")
</pallas_src>

<mosaic_0001>
module attributes {stable_mosaic.version = 11 : i64} {
  func.func @_relu_dwconv_bn_kernel(%arg0: i32, %arg1: memref<2x1x16x16xf32, #tpu.memory_space<vmem>>, %arg2: memref<4x9xf32, #tpu.memory_space<smem>>, %arg3: memref<4xf32, #tpu.memory_space<smem>>, %arg4: memref<4xf32, #tpu.memory_space<smem>>, %arg5: memref<2x1x16x16xf32, #tpu.memory_space<vmem>>, %arg6: memref<2x16x16xf32, #tpu.memory_space<vmem>>) attributes {dimension_semantics = [#tpu.dimension_semantics<parallel>], iteration_bounds = array<i64: 4>, scalar_prefetch = 0 : i64, scratch_operands = 1 : i64, tpu.core_type = #tpu.core_type<tc>, window_params = [{transform_indices = @transform_0, window_bounds = array<i64: 2, 1, 16, 16>}, {transform_indices = @transform_1, window_bounds = array<i64: 4, 9>}, {transform_indices = @transform_2, window_bounds = array<i64: 4>}, {transform_indices = @transform_3, window_bounds = array<i64: 4>}, {transform_indices = @transform_4, window_bounds = array<i64: 2, 1, 16, 16>}]} {
    %0 = arith.index_cast %arg0 : i32 to index
    %c0 = arith.constant 0 : index
    %1 = memref.load %arg2[%0, %c0] : memref<4x9xf32, #tpu.memory_space<smem>>
    %2 = arith.index_cast %arg0 : i32 to index
    %c1 = arith.constant 1 : index
    %3 = memref.load %arg2[%2, %c1] : memref<4x9xf32, #tpu.memory_space<smem>>
    %4 = arith.index_cast %arg0 : i32 to index
    %c2 = arith.constant 2 : index
    %5 = memref.load %arg2[%4, %c2] : memref<4x9xf32, #tpu.memory_space<smem>>
    %6 = arith.index_cast %arg0 : i32 to index
    %c3 = arith.constant 3 : index
    %7 = memref.load %arg2[%6, %c3] : memref<4x9xf32, #tpu.memory_space<smem>>
    %8 = arith.index_cast %arg0 : i32 to index
    %c4 = arith.constant 4 : index
    %9 = memref.load %arg2[%8, %c4] : memref<4x9xf32, #tpu.memory_space<smem>>
    %10 = arith.index_cast %arg0 : i32 to index
    %c5 = arith.constant 5 : index
    %11 = memref.load %arg2[%10, %c5] : memref<4x9xf32, #tpu.memory_space<smem>>
    %12 = arith.index_cast %arg0 : i32 to index
    %c6 = arith.constant 6 : index
    %13 = memref.load %arg2[%12, %c6] : memref<4x9xf32, #tpu.memory_space<smem>>
    %14 = arith.index_cast %arg0 : i32 to index
    %c7 = arith.constant 7 : index
    %15 = memref.load %arg2[%14, %c7] : memref<4x9xf32, #tpu.memory_space<smem>>
    %16 = arith.index_cast %arg0 : i32 to index
    %c8 = arith.constant 8 : index
    %17 = memref.load %arg2[%16, %c8] : memref<4x9xf32, #tpu.memory_space<smem>>
    %c0_0 = arith.constant 0 : index
    %c0_1 = arith.constant 0 : index
    %c0_2 = arith.constant 0 : index
    %c0_3 = arith.constant 0 : index
    %18 = vector.load %arg1[%c0_0, %c0_1, %c0_2, %c0_3] : memref<2x1x16x16xf32, #tpu.memory_space<vmem>>, vector<2x1x16x16xf32>
    %19 = vector.shape_cast %18 : vector<2x1x16x16xf32> to vector<2x16x16xf32>
    %cst = arith.constant 0.000000e+00 : f32
    %20 = vector.broadcast %cst : f32 to vector<2x16x16xf32>
    %21 = arith.maximumf %19, %20 : vector<2x16x16xf32>
    %22 = vector.broadcast %9 : f32 to vector<2x16x16xf32>
    %23 = arith.mulf %21, %22 : vector<2x16x16xf32>
    %c0_4 = arith.constant 0 : index
    %c0_5 = arith.constant 0 : index
    %c0_6 = arith.constant 0 : index
    %24 = vector.load %arg6[%c0_4, %c0_5, %c0_6] : memref<2x16x16xf32, #tpu.memory_space<vmem>>, vector<2x16x16xf32>
    tpu.vector_store %arg6[%c0_4, %c0_5, %c0_6], %23 {strides = array<i32>} : memref<2x16x16xf32, #tpu.memory_space<vmem>>, vector<2x16x16xf32>,
    %25 = vector.extract_strided_slice %21 {offsets = [0, 0, 0], sizes = [2, 15, 16], strides = [1, 1, 1]} : vector<2x16x16xf32> to vector<2x15x16xf32>
    %26 = vector.broadcast %3 : f32 to vector<2x15x16xf32>
    %27 = arith.mulf %25, %26 : vector<2x15x16xf32>
    %c0_7 = arith.constant 0 : index
    %c1_8 = arith.constant 1 : index
    %c0_9 = arith.constant 0 : index
    %28 = vector.load %arg6[%c0_7, %c1_8, %c0_9] : memref<2x16x16xf32, #tpu.memory_space<vmem>>, vector<2x15x16xf32>
    %29 = arith.addf %28, %27 : vector<2x15x16xf32>
    %c0_10 = arith.constant 0 : index
    %c1_11 = arith.constant 1 : index
    %c0_12 = arith.constant 0 : index
    %30 = vector.load %arg6[%c0_10, %c1_11, %c0_12] : memref<2x16x16xf32, #tpu.memory_space<vmem>>, vector<2x15x16xf32>
    tpu.vector_store %arg6[%c0_10, %c1_11, %c0_12], %29 {strides = array<i32>} : memref<2x16x16xf32, #tpu.memory_space<vmem>>, vector<2x15x16xf32>,
    %31 = vector.extract_strided_slice %21 {offsets = [0, 1, 0], sizes = [2, 15, 16], strides = [1, 1, 1]} : vector<2x16x16xf32> to vector<2x15x16xf32>
    %32 = vector.broadcast %15 : f32 to vector<2x15x16xf32>
    %33 = arith.mulf %31, %32 : vector<2x15x16xf32>
    %c0_13 = arith.constant 0 : index
    %c0_14 = arith.constant 0 : index
    %c0_15 = arith.constant 0 : index
    %34 = vector.load %arg6[%c0_13, %c0_14, %c0_15] : memref<2x16x16xf32, #tpu.memory_space<vmem>>, vector<2x15x16xf32>
    %35 = arith.addf %34, %33 : vector<2x15x16xf32>
    %c0_16 = arith.constant 0 : index
    %c0_17 = arith.constant 0 : index
    %c0_18 = arith.constant 0 : index
    %36 = vector.load %arg6[%c0_16, %c0_17, %c0_18] : memref<2x16x16xf32, #tpu.memory_space<vmem>>, vector<2x15x16xf32>
    tpu.vector_store %arg6[%c0_16, %c0_17, %c0_18], %35 {strides = array<i32>} : memref<2x16x16xf32, #tpu.memory_space<vmem>>, vector<2x15x16xf32>,
    %c0_19 = arith.constant 0 : index
    %c0_20 = arith.constant 0 : index
    %c0_21 = arith.constant 0 : index
    %c0_22 = arith.constant 0 : index
    %37 = vector.load %arg1[%c0_19, %c0_20, %c0_21, %c0_22] : memref<2x1x16x16xf32, #tpu.memory_space<vmem>>, vector<2x1x16x15xf32>
    %38 = vector.shape_cast %37 : vector<2x1x16x15xf32> to vector<2x16x15xf32>
    %cst_23 = arith.constant 0.000000e+00 : f32
    %39 = vector.broadcast %cst_23 : f32 to vector<2x16x15xf32>
    %40 = arith.maximumf %38, %39 : vector<2x16x15xf32>
    %41 = vector.extract_strided_slice %40 {offsets = [0, 0, 0], sizes = [2, 15, 15], strides = [1, 1, 1]} : vector<2x16x15xf32> to vector<2x15x15xf32>
    %42 = vector.broadcast %1 : f32 to vector<2x15x15xf32>
    %43 = arith.mulf %41, %42 : vector<2x15x15xf32>
    %c0_24 = arith.constant 0 : index
    %c1_25 = arith.constant 1 : index
    %c1_26 = arith.constant 1 : index
    %44 = vector.load %arg6[%c0_24, %c1_25, %c1_26] : memref<2x16x16xf32, #tpu.memory_space<vmem>>, vector<2x15x15xf32>
    %45 = arith.addf %44, %43 : vector<2x15x15xf32>
    %c0_27 = arith.constant 0 : index
    %c1_28 = arith.constant 1 : index
    %c1_29 = arith.constant 1 : index
    %46 = vector.load %arg6[%c0_27, %c1_28, %c1_29] : memref<2x16x16xf32, #tpu.memory_space<vmem>>, vector<2x15x15xf32>
    tpu.vector_store %arg6[%c0_27, %c1_28, %c1_29], %45 {strides = array<i32>} : memref<2x16x16xf32, #tpu.memory_space<vmem>>, vector<2x15x15xf32>,
    %47 = vector.broadcast %7 : f32 to vector<2x16x15xf32>
    %48 = arith.mulf %40, %47 : vector<2x16x15xf32>
    %c0_30 = arith.constant 0 : index
    %c0_31 = arith.constant 0 : index
    %c1_32 = arith.constant 1 : index
    %49 = vector.load %arg6[%c0_30, %c0_31, %c1_32] : memref<2x16x16xf32, #tpu.memory_space<vmem>>, vector<2x16x15xf32>
    %50 = arith.addf %49, %48 : vector<2x16x15xf32>
    %c0_33 = arith.constant 0 : index
    %c0_34 = arith.constant 0 : index
    %c1_35 = arith.constant 1 : index
    %51 = vector.load %arg6[%c0_33, %c0_34, %c1_35] : memref<2x16x16xf32, #tpu.memory_space<vmem>>, vector<2x16x15xf32>
    tpu.vector_store %arg6[%c0_33, %c0_34, %c1_35], %50 {strides = array<i32>} : memref<2x16x16xf32, #tpu.memory_space<vmem>>, vector<2x16x15xf32>,
    %52 = vector.extract_strided_slice %40 {offsets = [0, 1, 0], sizes = [2, 15, 15], strides = [1, 1, 1]} : vector<2x16x15xf32> to vector<2x15x15xf32>
    %53 = vector.broadcast %13 : f32 to vector<2x15x15xf32>
    %54 = arith.mulf %52, %53 : vector<2x15x15xf32>
    %c0_36 = arith.constant 0 : index
    %c0_37 = arith.constant 0 : index
    %c1_38 = arith.constant 1 : index
    %55 = vector.load %arg6[%c0_36, %c0_37, %c1_38] : memref<2x16x16xf32, #tpu.memory_space<vmem>>, vector<2x15x15xf32>
    %56 = arith.addf %55, %54 : vector<2x15x15xf32>
    %c0_39 = arith.constant 0 : index
    %c0_40 = arith.constant 0 : index
    %c1_41 = arith.constant 1 : index
    %57 = vector.load %arg6[%c0_39, %c0_40, %c1_41] : memref<2x16x16xf32, #tpu.memory_space<vmem>>, vector<2x15x15xf32>
    tpu.vector_store %arg6[%c0_39, %c0_40, %c1_41], %56 {strides = array<i32>} : memref<2x16x16xf32, #tpu.memory_space<vmem>>, vector<2x15x15xf32>,
    %c0_42 = arith.constant 0 : index
    %c0_43 = arith.constant 0 : index
    %c0_44 = arith.constant 0 : index
    %c1_45 = arith.constant 1 : index
    %58 = vector.load %arg1[%c0_42, %c0_43, %c0_44, %c1_45] : memref<2x1x16x16xf32, #tpu.memory_space<vmem>>, vector<2x1x16x15xf32>
    %59 = vector.shape_cast %58 : vector<2x1x16x15xf32> to vector<2x16x15xf32>
    %cst_46 = arith.constant 0.000000e+00 : f32
    %60 = vector.broadcast %cst_46 : f32 to vector<2x16x15xf32>
    %61 = arith.maximumf %59, %60 : vector<2x16x15xf32>
    %62 = vector.extract_strided_slice %61 {offsets = [0, 0, 0], sizes = [2, 15, 15], strides = [1, 1, 1]} : vector<2x16x15xf32> to vector<2x15x15xf32>
    %63 = vector.broadcast %5 : f32 to vector<2x15x15xf32>
    %64 = arith.mulf %62, %63 : vector<2x15x15xf32>
    %c0_47 = arith.constant 0 : index
    %c1_48 = arith.constant 1 : index
    %c0_49 = arith.constant 0 : index
    %65 = vector.load %arg6[%c0_47, %c1_48, %c0_49] : memref<2x16x16xf32, #tpu.memory_space<vmem>>, vector<2x15x15xf32>
    %66 = arith.addf %65, %64 : vector<2x15x15xf32>
    %c0_50 = arith.constant 0 : index
    %c1_51 = arith.constant 1 : index
    %c0_52 = arith.constant 0 : index
    %67 = vector.load %arg6[%c0_50, %c1_51, %c0_52] : memref<2x16x16xf32, #tpu.memory_space<vmem>>, vector<2x15x15xf32>
    tpu.vector_store %arg6[%c0_50, %c1_51, %c0_52], %66 {strides = array<i32>} : memref<2x16x16xf32, #tpu.memory_space<vmem>>, vector<2x15x15xf32>,
    %68 = vector.broadcast %11 : f32 to vector<2x16x15xf32>
    %69 = arith.mulf %61, %68 : vector<2x16x15xf32>
    %c0_53 = arith.constant 0 : index
    %c0_54 = arith.constant 0 : index
    %c0_55 = arith.constant 0 : index
    %70 = vector.load %arg6[%c0_53, %c0_54, %c0_55] : memref<2x16x16xf32, #tpu.memory_space<vmem>>, vector<2x16x15xf32>
    %71 = arith.addf %70, %69 : vector<2x16x15xf32>
    %c0_56 = arith.constant 0 : index
    %c0_57 = arith.constant 0 : index
    %c0_58 = arith.constant 0 : index
    %72 = vector.load %arg6[%c0_56, %c0_57, %c0_58] : memref<2x16x16xf32, #tpu.memory_space<vmem>>, vector<2x16x15xf32>
    tpu.vector_store %arg6[%c0_56, %c0_57, %c0_58], %71 {strides = array<i32>} : memref<2x16x16xf32, #tpu.memory_space<vmem>>, vector<2x16x15xf32>,
    %73 = vector.extract_strided_slice %61 {offsets = [0, 1, 0], sizes = [2, 15, 15], strides = [1, 1, 1]} : vector<2x16x15xf32> to vector<2x15x15xf32>
    %74 = vector.broadcast %17 : f32 to vector<2x15x15xf32>
    %75 = arith.mulf %73, %74 : vector<2x15x15xf32>
    %c0_59 = arith.constant 0 : index
    %c0_60 = arith.constant 0 : index
    %c0_61 = arith.constant 0 : index
    %76 = vector.load %arg6[%c0_59, %c0_60, %c0_61] : memref<2x16x16xf32, #tpu.memory_space<vmem>>, vector<2x15x15xf32>
    %77 = arith.addf %76, %75 : vector<2x15x15xf32>
    %c0_62 = arith.constant 0 : index
    %c0_63 = arith.constant 0 : index
    %c0_64 = arith.constant 0 : index
    %78 = vector.load %arg6[%c0_62, %c0_63, %c0_64] : memref<2x16x16xf32, #tpu.memory_space<vmem>>, vector<2x15x15xf32>
    tpu.vector_store %arg6[%c0_62, %c0_63, %c0_64], %77 {strides = array<i32>} : memref<2x16x16xf32, #tpu.memory_space<vmem>>, vector<2x15x15xf32>,
    %c0_65 = arith.constant 0 : index
    %c0_66 = arith.constant 0 : index
    %c0_67 = arith.constant 0 : index
    %79 = vector.load %arg6[%c0_65, %c0_66, %c0_67] : memref<2x16x16xf32, #tpu.memory_space<vmem>>, vector<2x16x16xf32>
    %80 = vector.shape_cast %79 : vector<2x16x16xf32> to vector<1x2x16x16xf32>
    %cst_68 = arith.constant dense<0.000000e+00> : vector<1xf32>
    %81 = vector.multi_reduction <add>, %80, %cst_68 [1, 2, 3] : vector<1x2x16x16xf32> to vector<1xf32>
    %82 = vector.shape_cast %81 : vector<1xf32> to vector<1x1x1x1xf32>
    %83 = vector.extract %82[0, 0, 0, 0] : f32 from vector<1x1x1x1xf32>
    %84 = vector.broadcast %83 : f32 to vector<1x1x1xf32>
    %cst_69 = arith.constant 0.001953125 : f32
    %85 = vector.broadcast %cst_69 : f32 to vector<1x1x1xf32>
    %86 = arith.mulf %84, %85 : vector<1x1x1xf32>
    %87 = vector.broadcast %86 : vector<1x1x1xf32> to vector<2x16x16xf32>
    %88 = arith.subf %79, %87 : vector<2x16x16xf32>
    %89 = arith.mulf %88, %88 : vector<2x16x16xf32>
    %90 = vector.shape_cast %89 : vector<2x16x16xf32> to vector<1x2x16x16xf32>
    %cst_70 = arith.constant dense<0.000000e+00> : vector<1xf32>
    %91 = vector.multi_reduction <add>, %90, %cst_70 [1, 2, 3] : vector<1x2x16x16xf32> to vector<1xf32>
    %92 = vector.shape_cast %91 : vector<1xf32> to vector<1x1x1x1xf32>
    %93 = vector.extract %92[0, 0, 0, 0] : f32 from vector<1x1x1x1xf32>
    %94 = vector.broadcast %93 : f32 to vector<1x1x1xf32>
    %cst_71 = arith.constant 0.001953125 : f32
    %95 = vector.broadcast %cst_71 : f32 to vector<1x1x1xf32>
    %96 = arith.mulf %94, %95 : vector<1x1x1xf32>
    %97 = arith.index_cast %arg0 : i32 to index
    %98 = memref.load %arg3[%97] : memref<4xf32, #tpu.memory_space<smem>>
    %cst_72 = arith.constant 9.99999974E-6 : f32
    %99 = vector.broadcast %cst_72 : f32 to vector<1x1x1xf32>
    %100 = arith.addf %96, %99 : vector<1x1x1xf32>
    %101 = math.rsqrt %100 : vector<1x1x1xf32>
    %102 = vector.broadcast %98 : f32 to vector<1x1x1xf32>
    %103 = arith.mulf %102, %101 : vector<1x1x1xf32>
    %104 = vector.broadcast %103 : vector<1x1x1xf32> to vector<2x16x16xf32>
    %105 = arith.mulf %88, %104 : vector<2x16x16xf32>
    %106 = arith.index_cast %arg0 : i32 to index
    %107 = memref.load %arg4[%106] : memref<4xf32, #tpu.memory_space<smem>>
    %108 = vector.broadcast %107 : f32 to vector<2x16x16xf32>
    %109 = arith.addf %105, %108 : vector<2x16x16xf32>
    %c0_73 = arith.constant 0 : index
    %c0_74 = arith.constant 0 : index
    %c0_75 = arith.constant 0 : index
    %c0_76 = arith.constant 0 : index
    %110 = vector.load %arg5[%c0_73, %c0_74, %c0_75, %c0_76] : memref<2x1x16x16xf32, #tpu.memory_space<vmem>>, vector<2x1x16x16xf32>
    %111 = vector.shape_cast %110 : vector<2x1x16x16xf32> to vector<2x16x16xf32>
    %112 = vector.shape_cast %109 : vector<2x16x16xf32> to vector<2x1x16x16xf32>
    tpu.vector_store %arg5[%c0_73, %c0_74, %c0_75, %c0_76], %112 {strides = array<i32>} : memref<2x1x16x16xf32, #tpu.memory_space<vmem>>, vector<2x1x16x16xf32>,
    return
  }
  func.func @transform_0(%arg0: i32) -> (i32, i32, i32, i32) {
    %c0_i32 = arith.constant 0 : i32
    %c0_i32_0 = arith.constant 0 : i32
    %c0_i32_1 = arith.constant 0 : i32
    %c0_i32_2 = arith.constant 0 : i32
    return %c0_i32, %arg0, %c0_i32_0, %c0_i32_1 : i32, i32, i32, i32
  }
  func.func @transform_1(%arg0: i32) -> (i32, i32) {
    %c0_i32 = arith.constant 0 : i32
    %c0_i32_0 = arith.constant 0 : i32
    %c0_i32_1 = arith.constant 0 : i32
    return %c0_i32, %c0_i32_0 : i32, i32
  }
  func.func @transform_2(%arg0: i32) -> i32 {
    %c0_i32 = arith.constant 0 : i32
    %c0_i32_0 = arith.constant 0 : i32
    return %c0_i32 : i32
  }
  func.func @transform_3(%arg0: i32) -> i32 {
    %c0_i32 = arith.constant 0 : i32
    %c0_i32_0 = arith.constant 0 : i32
    return %c0_i32 : i32
  }
  func.func @transform_4(%arg0: i32) -> (i32, i32, i32, i32) {
    %c0_i32 = arith.constant 0 : i32
    %c0_i32_0 = arith.constant 0 : i32
    %c0_i32_1 = arith.constant 0 : i32
    %c0_i32_2 = arith.constant 0 : i32
    return %c0_i32, %arg0, %c0_i32_0, %c0_i32_1 : i32, i32, i32, i32
  }
}

</mosaic_0001>

<bundles_post_ra>
// kernel: alt_depthwise_separable_conv.1
= control target key start
LH: loop header
LB: loop body
LE: loop exit
PB: predicated region body
PF: predicated region fallthrough
CT: control target
= control target key end

     0   :  { %9 = vsyncpa [#allocation4], 0  ;;  %s1390_s0 = inlined_call_operand.hbm [shape: f32[2,4,16,16], index: 0, kind: input, shape index: {}]   ;;  %s1391_s1 = inlined_call_operand.vmem [shape: f32[4,9], index: 1, kind: input, shape index: {}]   ;;  %s1392_s2 = inlined_call_operand.vmem [shape: f32[4], index: 2, kind: input, shape index: {}]   ;;  %s1393_s3 = inlined_call_operand.vmem [shape: f32[4], index: 3, kind: input, shape index: {}]   ;;  %s1394_s4 = inlined_call_operand.hbm [shape: f32[2,4,16,16], index: 4, kind: output, shape index: {}]  }
   0x1   :  { %11 = vsyncpa [#allocation4 + $0x1], 0 }
   0x2   :  { %12 = vsyncpa [#allocation6], 0 }
   0x3   :  { %13 = vsyncpa [#allocation9], 0 }
   0x4   :  { %14 = vsyncpa [#allocation5], 0 }
   0x5   :  { %16 = vsyncpa [#allocation5 + $0x1], 0  ;;  %s1077_s15 = smov 0   ;;  %s1079_s16 = smov 0  }
   0x6   :  { %s1081_s17 = smov 0   ;;  %s1083_s18 = smov 0  }
   0x7 LB: > { %s1098_s19 = sadd.s32 4294967295, %s1032_s18   ;;  %s810_s20 = sadd.s32 4294967294, %s1032_s18   ;;  %s1032_s18 = sphi %s1083_s18, %s1418_s18   ;;  %s1028_s17 = sphi %s1081_s17, %s1417_s17   ;;  %s1024_s16 = sphi %s1079_s16, %s1416_s16   ;;  %s1020_s15 = sphi %s1077_s15, %s1415_s15  }
   0x8   : > { %s1102_s21 = sadd.s32 1, %s1032_s18   ;;  %s29_s22 = sadd.s32 1, %s1028_s17 }
   0x9   : > { %s26_s23 = ssub.s32 %s1032_s18, %s1102_s21  ;;  %p36_p0 = scmp.ne.s32.totalorder %s1028_s17, %s1024_s16 }
   0xa   : > { %p27_p1 = scmp.eq.s32.totalorder %s26_s23, 0  ;;  %p37_p2 = scmp.eq.s32.totalorder %s1032_s18, 0 }
   0xb   : > { %p42_p3 = scmp.ne.s32.totalorder %s1024_s16, %s1020_s15  ;;  %p1395_p4 = scmp.eq.s32.totalorder %s1098_s19, 0 }
   0xc   : > { %s1114_s24 = scalar_select %p27_p1, %s1028_s17, %s29_s22  }
   0xd   : > { %p1116_p5 = por %p37_p2, %p36_p0  ;;  %p1122_p6 = por %p1395_p4, %p42_p3 }
   0xe   : > { %p129_p7 = scmp.eq.s32.totalorder %s1098_s19, 3  ;;  %p135_p8 = scmp.eq.s32.totalorder %s810_s20, 3 }
   0xf   : > { %s1400_s25 = scalar_select %p1116_p5, 1, 0 }
  0x10   : > { %s1401_s26 = scalar_select %p1122_p6, 1, 0 }
  0x11   : > { %p811_p9 = scmp.ge.s32.totalorder %s1032_s18, 1  ;;  %p142_p10 = scmp.lt.s32.totalorder %s1032_s18, 5 }
  0x12   : > { %p1129_p11 = por %p129_p7, %p36_p0  ;;  %p1133_p12 = por %p135_p8, %p42_p3 }
  0x13   : > { %p1137_p13 = pnand %p811_p9, %p142_p10  ;;  %s166_s6 = sshll.u32 %s1392_s2, 4  ;;  %s167_s6 = int_to_ptr.vmem [resolvable:$true] %s166_s6 }
  0x14   : > { %s1402_s27 = scalar_select %p1129_p11, 1, 0 }
  0x15   : > { %s1403_s28 = scalar_select %p1133_p12, 1, 0 }
  0x16   : > { %s1404_s29 = scalar_select %p1137_p13, 1, 0 }
  0x17   : > { %p868_p1 = pneg %p1137_p13  ;;  %s155_s9 = sshll.u32 %s1391_s1, 4  ;;  %s156_s9 = int_to_ptr.vmem [resolvable:$true] %s155_s9 }
  0x18   : > { %s177_s13 = sshll.u32 %s1393_s3, 4  ;;  %s941_s14 = scalar_lea.vmem %s167_s6, 16  ;;  %s1158_s13 = int_to_ptr.vmem [resolvable:$true] %s177_s13 }
  0x19   : > { %p1151_p0 = pnand %p868_p1, %p1395_p4  ;;  %p942_p2 = scmp.ne.s32.totalorder %s167_s6, %s941_s14 }
  0x1a   : > { %p949_p9 = scmp.lt.s32.totalorder %s167_s6, %s167_s6  ;;  %p950_p10 = scmp.lt.s32.totalorder %s941_s14, %s941_s14 }
  0x1b   : > { %p943_p3 = pneg %p1151_p0 }
  0x1c   : > { %p951_p1 = por %p950_p10, %p949_p9 }
  0x1d   : > { %p944_p7 = pnand %p943_p3, %p942_p2 }
  0x1f   : > { %p945_p8 = pneg %p944_p7 }
  0x21   : > { %p952_p4 = pnand %p951_p1, %p945_p8 }
  0x23   : > { %955 = shalt.err (!%p952_p4)
}
  0x24   : > { %s1034_s20 = smov [#allocation8]   ;;  %s956_s22 = scalar_lea.vmem %s156_s9, 64 }
  0x25   : > { %874 = dma.vmem_to_smem (!%p1151_p0), %s167_s6, 16, %s1034_s20, [#allocation9]  }
  0x26   : > { %p957_p12 = scmp.ne.s32.totalorder %s156_s9, %s956_s22  ;;  %p964_p13 = scmp.lt.s32.totalorder %s156_s9, %s156_s9 }
  0x27   : > { %p965_p5 = scmp.lt.s32.totalorder %s956_s22, %s956_s22 }
  0x28   : > { %p959_p11 = pnand %p957_p12, %p943_p3 }
  0x29   : > { %p966_p2 = por %p965_p5, %p964_p13 }
  0x2a   : > { %p960_p6 = pneg %p959_p11 }
  0x2c   : > { %p967_p7 = pnand %p966_p2, %p960_p6 }
  0x2e   : > { %970 = shalt.err (!%p967_p7)
}
  0x2f   : > { %s1035_s23 = smov [#allocation7]   ;;  %s971_s30 = scalar_lea.vmem %s1158_s13, 16 }
  0x30   : > { %871 = dma.vmem_to_smem (!%p1151_p0), %s156_s9, 64, %s1035_s23, [#allocation6]  }
  0x31   : > { %p972_p4 = scmp.ne.s32.totalorder %s1158_s13, %s971_s30  ;;  %p979_p11 = scmp.lt.s32.totalorder %s1158_s13, %s1158_s13 }
  0x32   : > { %p980_p9 = scmp.lt.s32.totalorder %s971_s30, %s971_s30 }
  0x33   : > { %p974_p8 = pnand %p972_p4, %p943_p3 }
  0x34   : > { %p981_p5 = por %p980_p9, %p979_p11 }
  0x35   : > { %p975_p12 = pneg %p974_p8 }
  0x37   : > { %p982_p6 = pnand %p981_p5, %p975_p12 }
  0x39   : > { %985 = shalt.err (!%p982_p6)
}
  0x3a   : > { %s1036_s5 = smov [#allocation10]   ;;  %p815_p13 = scmp.ge.s32.totalorder %s1032_s18, 4 }
  0x3b   : > { %877 = dma.vmem_to_smem (!%p1151_p0), %s1158_s13, 16, %s1036_s5, [#allocation9]  }
  0x3c   : > { %184 = sbr.rel (%p815_p13) target bundleno = 82 (0x52), region = 28 }
  0x43   : > { %s188_s6 = sand.u32 1, %s1028_s17   ;;  %s833_s7 = sshll.u32 %s1032_s18, 8 }
  0x44   : > { %s816_s8 = sshll.u32 %s188_s6, 5  ;;  %s198_s10 = scalar_lea.hbm %s1390_s0, %s833_s7 }
  0x45   : > { %p1406_p3 = scmp.ne.s32.totalorder %s1400_s25, 0  ;;  %s192_s13 = scalar_lea.vmem [#allocation3], %s816_s8 }
  0x46   : > { %s211_s14 = sshll.u32 %s192_s13, 4  ;;  %s1037_s22 = smov 1024   ;;  %s212_s14 = int_to_ptr.vmem [resolvable:$true] %s211_s14 }
  0x47   : > { %s845_s12 = scalar_select %p1406_p3, [#allocation0], [#allocation16] }
  0x48   : > { %846 = sst [smem:[#allocation13]] (%p1406_p3), %s1037_s22  ;;  %s1038_s23 = smov 256  }
  0x49   : > { %s203_s20 = sld [smem:[%s845_s12]]   ;;  %s1039_s30 = smov 2  }
  0x4a   : > { %847 = sst [smem:[#allocation13 + $0x1]] (%p1406_p3), %s1038_s23  ;;  %s1040_s5 = smov 128  }
  0x4b   : > { %848 = sst [smem:[#allocation13 + $0x2]] (%p1406_p3), %s1039_s30  ;;  %s1041_s8 = smov 8  }
  0x4c   : > { %849 = sst [smem:[#allocation13 + $0x3]] (%p1406_p3), %s1040_s5  ;;  %s189_s11 = scalar_lea.sflag [#allocation4], %s188_s6 }
  0x4d   : > { %850 = sst [smem:[#allocation13 + $0x4]] (%p1406_p3), %s1040_s5  ;;  %s1042_s12 = smov [#allocation12]  }
  0x4e   : > { %851 = sst [smem:[#allocation13 + $0x5]] (%p1406_p3), %s1041_s8 }
  0x4f   : > { %s819_s7 = sshll.u32 %s203_s20, 26 }
  0x50   : > { %s820_s9 = sadd.s32 134217728, %s819_s7 }
  0x51   : > { %852 = dma.general (%p1406_p3), %s198_s10, 512, %s212_s14, %s189_s11, %s1042_s12, [#allocation13], %s820_s9, 0  }
  0x52 PF: > { %p1407_p0 = scmp.ne.s32.totalorder %s1404_s29, 0 }
  0x53   : > { %s1207_s13 = sand.u32 (!%p1407_p0), 1, %s1024_s16   ;;  %p1408_p10 = scmp.ne.s32.totalorder (!%p1407_p0), %s1401_s26, 0 }
  0x54   : > { %236 = sbr.rel (%p1407_p0) target bundleno = 756 (0x2f4), region = 36  ;;  %s822_s20 = sshll.u32 (!%p1407_p0), %s1207_s13, 5 }
  0x55   : > { %s239_s22 = scalar_lea.sflag (!%p1407_p0), [#allocation4], %s1207_s13  ;;  %s242_s23 = scalar_lea.vmem (!%p1407_p0), [#allocation3], %s822_s20 }
  0x5b   : > { %1003 = dma.done.wait (%p1408_p10), %s239_s22, 512  }
  0x5c   : > { %1005 = vsyncadd (%p1408_p10), %s239_s22, 4294966784  ;;  %p1409_p1 = scmp.eq.s32.totalorder %s1098_s19, 0 }
  0x5e   : > { %1007 = dma.done.wait (%p1409_p1), [#allocation6], 64   ;;  %p1410_p2 = pmov %p1409_p1 }
  0x5f   : > { %p1411_p7 = pmov %p1409_p1 }
  0x60   : > { %1009 = vsyncadd (%p1410_p2), [#allocation6], 4294967232 }
  0x61   : > { %1011 = dma.done.wait (%p1411_p7), [#allocation9], 32   ;;  %p1412_p4 = pmov %p1409_p1 }
  0x63   : > { %1013 = vsyncadd (%p1412_p4), [#allocation9], 4294967264 }
  0x64   : > { %259 = sfence }
  0x65   : > { %s1226_s25 = sshll.u32 %s1098_s19, 7  ;;  %v368_v0 = vld [vmem:[%s242_s23 + $0x10] sm:$0xff]  ;;  %v366_v1 = vld [vmem:[%s242_s23] sm:$0xff]  ;;  %v369_v2 = vld [vmem:[%s242_s23 + $0x18] sm:$0xff]  ;;  %s1043_s12 = smov 1   ;;  %vm311_vm0 = vcmask 130048  }
  0x66   : > { %s281_s26 = sld [smem:[#allocation7 + %s1226_s25]]  ;;  %s286_s29 = sadd.s32 3, %s1226_s25  ;;  %v367_v3 = vld [vmem:[%s242_s23 + $0x8] sm:$0xff]  ;;  %v1232_v4 = vmax.f32 %v368_v0, 0.0  ;;  %v1234_v5 = vmax.f32 %v366_v1, 0.0  ;;  %v1237_v6 = vmax.f32 %v369_v2, 0.0 }
  0x67   : > { %s287_s6 = sld [smem:[#allocation7 + %s286_s29]]  ;;  %s282_s10 = sadd.s32 1, %s1226_s25  ;;  %v1239_v7 = vmax.f32 %v367_v3, 0.0  ;;  %vm330_vm1 = vcmask 129024   ;;  %vm347_vm2 = vcmask 1046528   ;;  %vm403_vm3 = vcmask 130056  }
  0x68   : > { %s288_s14 = sadd.s32 4, %s1226_s25  ;;  %s292_s5 = sadd.s32 6, %s1226_s25  ;;  %vm405_vm4 = vcmask 129032   ;;  %vm520_vm5 = vcmask 120832   ;;  %vm518_vm6 = vcmask 121856  }
  0x69   : > { %s289_s30 = sld [smem:[#allocation7 + %s288_s14]]  ;;  %s294_s9 = sadd.s32 7, %s1226_s25 }
  0x6a   : > { %s293_s7 = sld [smem:[#allocation7 + %s292_s5]]  ;;  %s284_s22 = sadd.s32 2, %s1226_s25 }
  0x6b   : > { %s283_s8 = sld [smem:[#allocation7 + %s282_s10]]  ;;  %s296_s29 = sadd.s32 8, %s1226_s25 }
  0x6c   : > { %v374_v8 = vstv %s281_s26  ;;  %s295_s11 = sld [smem:[#allocation7 + %s294_s9]]  ;;  %s290_s26 = sadd.s32 5, %s1226_s25 }
  0x6d   : > { %v377_v9 = vmul.f32 %v374_v8, %v1232_v4  ;;  %v375_v10 = vmul.f32 %v374_v8, %v1234_v5  ;;  %v378_v11 = vmul.f32 %v374_v8, %v1237_v6  ;;  %v376_v12 = vmul.f32 %v374_v8, %v1239_v7  ;;  %s1273_s23 = sld [smem:[#allocation7 + %s284_s22]]  ;;  %s1044_s25 = smov 127  }
  0x6e   : > { %v409_v14 = vstv %s287_s6  ;;  %s291_s6 = sld [smem:[#allocation7 + %s290_s26]]  ;;  %s664_s9 = scalar_lea.sflag [#allocation5], %s1207_s13 }
  0x6f   : > { %391 = vrot.lane.b32.xlu1 %v377_v9, %s1043_s12  ;;  %387 = vrot.lane.b32.xlu0 %v375_v10, %s1043_s12  ;;  %v306_v13 = vstv %s289_s30  ;;  %v410_v20 = vmul.f32 %v409_v14, %v1234_v5  ;;  %v411_v21 = vmul.f32 %v409_v14, %v1239_v7  ;;  %v412_v25 = vmul.f32 %v409_v14, %v1232_v4  ;;  %s297_s10 = sld [smem:[#allocation7 + %s296_s29]] }
  0x70   : > { %v307_v15 = vmul.f32 %v1234_v5, %v306_v13  ;;  %v308_v16 = vmul.f32 %v1239_v7, %v306_v13  ;;  %v309_v17 = vmul.f32 %v1232_v4, %v306_v13  ;;  %v310_v18 = vmul.f32 %v1237_v6, %v306_v13  ;;  %s644_s5 = sld [smem:[#allocation8 + %s1098_s19]] }
  0x71   : > { %v442_v19 = vstv %s293_s7  ;;  %v316_v22 = vstv %s283_s8  ;;  %v413_v29 = vmul.f32 %v409_v14, %v1237_v6  ;;  %s653_s7 = sld [smem:[#allocation10 + %s1098_s19]]  ;;  %s279_s8 = scalar_lea.vmem [#allocation11], %s822_s20 }
  0x72   : > { %312 = vst.msk [vmem:[#allocation2] sm:$0xff] %vm311_vm0, %v307_v15  ;;  %313 = vst.msk [vmem:[#allocation2 + $0x8] sm:$0xff] %vm311_vm0, %v308_v16  ;;  %v443_v23 = vmul.f32 %v442_v19, %v1234_v5  ;;  %v444_v24 = vmul.f32 %v442_v19, %v1239_v7  ;;  %v317_v26 = vmul.f32 %v1234_v5, %v316_v22  ;;  %v334_v28 = vstv %s295_s11 }
  0x73   : > { %314 = vst.msk [vmem:[#allocation2 + $0x10] sm:$0xff] %vm311_vm0, %v309_v17  ;;  %393 = vrot.lane.b32.xlu1 %v378_v11, %s1043_s12  ;;  %389 = vrot.lane.b32.xlu0 %v376_v12, %s1043_s12  ;;  %315 = vst.msk [vmem:[#allocation2 + $0x18] sm:$0xff] %vm311_vm0, %v310_v18  ;;  %v318_v27 = vmul.f32 %v1239_v7, %v316_v22  ;;  %v319_v30 = vmul.f32 %v1232_v4, %v316_v22  ;;  %v489_v56 = vstv %s1273_s23 }
  0x74   : > { %v320_v31 = vmul.f32 %v1237_v6, %v316_v22  ;;  %v455_v32 = vrot.slane %v443_v23, 1  ;;  %v456_v33 = vrot.slane %v444_v24, 1  ;;  %v445_v34 = vmul.f32 %v442_v19, %v1232_v4 }
  0x75   : > { %v446_v35 = vmul.f32 %v442_v19, %v1237_v6  ;;  %v335_v38 = vmul.f32 %v1234_v5, %v334_v28  ;;  %v336_v39 = vmul.f32 %v1239_v7, %v334_v28  ;;  %v337_v44 = vmul.f32 %v1232_v4, %v334_v28 }
  0x76   : > { %v338_v45 = vmul.f32 %v1237_v6, %v334_v28  ;;  %v457_v48 = vsel %vm347_vm2, %v455_v32, %v456_v33  ;;  %v458_v49 = vrot.slane %v445_v34, 1  ;;  %v491_v61 = vmul.f32 %v489_v56, %v1239_v7 }
  0x77   : > { %422 = vrot.lane.b32.xlu0 %v410_v20, %s1043_s12  ;;  %424 = vrot.lane.b32.xlu1 %v411_v21, %s1043_s12  ;;  %v459_v50 = vrot.slane %v446_v35, 1  ;;  %v348_v51 = vrot.slane %v335_v38, 1  ;;  %v349_v52 = vrot.slane %v336_v39, 1  ;;  %v351_v53 = vrot.slane %v337_v44, 1 }
  0x78   : > { %v352_v54 = vrot.slane %v338_v45, 1  ;;  %v490_v62 = vmul.f32 %v489_v56, %v1234_v5  ;;  %v493_v9 = vmul.f32 %v489_v56, %v1237_v6  ;;  %v492_v10 = vmul.f32 %v489_v56, %v1232_v4 }
  0x79   : > { %v321_v36 = vld [vmem:[#allocation2 + $0x1] sm:$0xff]  ;;  %v322_v37 = vld [vmem:[#allocation2 + $0x9] sm:$0x7f]  ;;  %v460_v55 = vsel %vm347_vm2, %v458_v49, %v459_v50  ;;  %v350_v57 = vsel %vm347_vm2, %v348_v51, %v349_v52  ;;  %v524_v11 = vstv %s291_s6  ;;  %v557_v12 = vstv %s297_s10 }
  0x7a   : > { %v323_v40 = vld [vmem:[#allocation2 + $0x11] sm:$0xff]  ;;  %v324_v41 = vld [vmem:[#allocation2 + $0x19] sm:$0x7f]  ;;  %v325_v42 = vadd.f32 %v321_v36, %v317_v26  ;;  %v326_v43 = vadd.f32 %v322_v37, %v318_v27  ;;  %v353_v58 = vsel %vm347_vm2, %v351_v53, %v352_v54  ;;  %v526_v13 = vmul.f32 %v524_v11, %v1239_v7 }
  0x7b   : > { %426 = vrot.lane.b32.xlu0 %v412_v25, %s1043_s12  ;;  %428 = vrot.lane.b32.xlu1 %v413_v29, %s1043_s12  ;;  %v327_v46 = vadd.f32 %v323_v40, %v319_v30  ;;  %v328_v47 = vadd.f32 %v324_v41, %v320_v31  ;;  %v525_v14 = vmul.f32 %v524_v11, %v1234_v5 }
  0x7c   : > { %329 = vst.msk [vmem:[#allocation2 + $0x1] sm:$0xff] %vm311_vm0, %v325_v42  ;;  %v559_v15 = vmul.f32 %v557_v12, %v1239_v7  ;;  %v558_v16 = vmul.f32 %v557_v12, %v1234_v5  ;;  %v528_v17 = vmul.f32 %v524_v11, %v1237_v6  ;;  %v527_v18 = vmul.f32 %v524_v11, %v1232_v4 }
  0x7d   : > { %331 = vst.msk [vmem:[#allocation2 + $0x9] sm:$0x7f] %vm330_vm1, %v326_v43  ;;  %333 = vst.msk [vmem:[#allocation2 + $0x19] sm:$0x7f] %vm330_vm1, %v328_v47  ;;  %v561_v21 = vmul.f32 %v557_v12, %v1237_v6  ;;  %v560_v22 = vmul.f32 %v557_v12, %v1232_v4 }
  0x7e   : > { %332 = vst.msk [vmem:[#allocation2 + $0x11] sm:$0xff] %vm311_vm0, %v327_v46  ;;  %v571_v19 = vrot.slane %v559_v15, 1  ;;  %v570_v20 = vrot.slane %v558_v16, 1 }
  0x7f   : > { %461 = vrot.lane.b32.xlu0 %v457_v48, %s1043_s12  ;;  %463 = vrot.lane.b32.xlu1 %v456_v33, %s1043_s12  ;;  %v574_v24 = vrot.slane %v561_v21, 1  ;;  %v573_v7 = vrot.slane %v560_v22, 1 }
  0x80   : > { %v572_v23 = vsel %vm347_vm2, %v570_v20, %v571_v19 }
  0x81   : > { %v575_v5 = vsel %vm347_vm2, %v573_v7, %v574_v24 }
  0x83   : > { %v339_v59 = vld [vmem:[#allocation2] sm:$0xff]  ;;  %465 = vrot.lane.b32.xlu0 %v460_v55, %s1043_s12  ;;  %467 = vrot.lane.b32.xlu1 %v459_v50, %s1043_s12 }
  0x84   : > { %v340_v60 = vld [vmem:[#allocation2 + $0x8] sm:$0x7f]  ;;  %v358_v1 = vadd.f32 %v350_v57, %v339_v59 }
  0x85   : > { %v341_v63 = vld [vmem:[#allocation2 + $0x10] sm:$0xff]  ;;  %v342_v0 = vld [vmem:[#allocation2 + $0x18] sm:$0x7f]  ;;  %v359_v2 = vadd.f32 %v349_v52, %v340_v60 }
  0x86   : > { %v360_v3 = vadd.f32 %v353_v58, %v341_v63  ;;  %v361_v8 = vadd.f32 %v352_v54, %v342_v0  ;;  %362 = vst.msk [vmem:[#allocation2] sm:$0xff] %vm311_vm0, %v358_v1 }
  0x87   : > { %363 = vst.msk [vmem:[#allocation2 + $0x8] sm:$0x7f] %vm330_vm1, %v359_v2  ;;  %504 = vrot.lane.b32.xlu1 %v491_v61, %s1044_s25  ;;  %502 = vrot.lane.b32.xlu0 %v490_v62, %s1044_s25 }
  0x88   : > { %364 = vst.msk [vmem:[#allocation2 + $0x10] sm:$0xff] %vm311_vm0, %v360_v3 }
  0x89   : > { %365 = vst.msk [vmem:[#allocation2 + $0x18] sm:$0x7f] %vm330_vm1, %v361_v8 }
  0x8b   : > { %508 = vrot.lane.b32.xlu1 %v493_v9, %s1044_s25  ;;  %506 = vrot.lane.b32.xlu0 %v492_v10, %s1044_s25 }
  0x8e   : > { %v379_v26 = vld [vmem:[#allocation2 + $0x1] sm:$0xff]  ;;  %v380_v30 = vld [vmem:[#allocation2 + $0x9] sm:$0x7f] }
  0x8f   : > { %539 = vrot.lane.b32.xlu1 %v526_v13, %s1044_s25  ;;  %537 = vrot.lane.b32.xlu0 %v525_v14, %s1044_s25 }
  0x90   : > { %v381_v25 = vld [vmem:[#allocation2 + $0x11] sm:$0xff]  ;;  %v382_v4 = vld [vmem:[#allocation2 + $0x19] sm:$0x7f] }
  0x93   : > { %543 = vrot.lane.b32.xlu1 %v528_v17, %s1044_s25  ;;  %541 = vrot.lane.b32.xlu0 %v527_v18, %s1044_s25 }
  0x97   : > { %578 = vrot.lane.b32.xlu1 %v571_v19, %s1044_s25  ;;  %576 = vrot.lane.b32.xlu0 %v572_v23, %s1044_s25 }
  0x9b   : > { %582 = vrot.lane.b32.xlu1 %v574_v24, %s1044_s25  ;;  %580 = vrot.lane.b32.xlu0 %v575_v5, %s1044_s25 }
  0xe1   : > { %v392_v27 = vpop.permute.xlu1 %391  ;;  %v388_v28 = vpop.permute.xlu0 %387 }
  0xe2   : > { %v401_v6 = vadd.f32 %v392_v27, %v381_v25  ;;  %v399_v29 = vadd.f32 %v388_v28, %v379_v26 }
  0xe4   : > { %407 = vst.msk [vmem:[#allocation2 + $0x11] sm:$0xff] %vm403_vm3, %v401_v6  ;;  %404 = vst.msk [vmem:[#allocation2 + $0x1] sm:$0xff] %vm403_vm3, %v399_v29 }
  0xe5   : > { %v394_v31 = vpop.permute.xlu1 %393  ;;  %v390_v32 = vpop.permute.xlu0 %389 }
  0xe6   : > { %v402_v33 = vadd.f32 %v394_v31, %v382_v4  ;;  %v400_v34 = vadd.f32 %v390_v32, %v380_v30 }
  0xe8   : > { %408 = vst.msk [vmem:[#allocation2 + $0x19] sm:$0x7f] %vm405_vm4, %v402_v33  ;;  %406 = vst.msk [vmem:[#allocation2 + $0x9] sm:$0x7f] %vm405_vm4, %v400_v34 }
  0xe9   : > { %v423_v35 = vpop.permute.xlu0 %422  ;;  %v425_v36 = vpop.permute.xlu1 %424 }
  0xeb   : > { %v414_v37 = vld [vmem:[#allocation2] sm:$0xff]  ;;  %v416_v38 = vld [vmem:[#allocation2 + $0x10] sm:$0xff] }
  0xec   : > { %v434_v39 = vadd.f32 %v423_v35, %v414_v37 }
  0xed   : > { %v427_v40 = vpop.permute.xlu0 %426  ;;  %v429_v41 = vpop.permute.xlu1 %428 }
  0xee   : > { %438 = vst.msk [vmem:[#allocation2] sm:$0xff] %vm403_vm3, %v434_v39  ;;  %v436_v42 = vadd.f32 %v427_v40, %v416_v38 }
  0xef   : > { %v415_v43 = vld [vmem:[#allocation2 + $0x8] sm:$0xff]  ;;  %v417_v44 = vld [vmem:[#allocation2 + $0x18] sm:$0xff] }
  0xf0   : > { %v435_v45 = vadd.f32 %v425_v36, %v415_v43  ;;  %440 = vst.msk [vmem:[#allocation2 + $0x10] sm:$0xff] %vm403_vm3, %v436_v42  ;;  %v437_v46 = vadd.f32 %v429_v41, %v417_v44 }
  0xf1   : > { %v462_v47 = vpop.permute.xlu0 %461  ;;  %v464_v48 = vpop.permute.xlu1 %463 }
  0xf2   : > { %439 = vst.msk [vmem:[#allocation2 + $0x8] sm:$0xff] %vm403_vm3, %v435_v45  ;;  %441 = vst.msk [vmem:[#allocation2 + $0x18] sm:$0xff] %vm403_vm3, %v437_v46 }
  0xf5   : > { %v447_v49 = vld [vmem:[#allocation2] sm:$0xff]  ;;  %v466_v50 = vpop.permute.xlu0 %465  ;;  %v468_v53 = vpop.permute.xlu1 %467 }
  0xf6   : > { %v473_v51 = vadd.f32 %v462_v47, %v447_v49 }
  0xf7   : > { %v449_v52 = vld [vmem:[#allocation2 + $0x10] sm:$0xff] }
  0xf8   : > { %477 = vst.msk [vmem:[#allocation2] sm:$0xff] %vm403_vm3, %v473_v51  ;;  %v475_v54 = vadd.f32 %v466_v50, %v449_v52 }
  0xf9   : > { %v448_v55 = vld [vmem:[#allocation2 + $0x8] sm:$0x7f]  ;;  %v450_v56 = vld [vmem:[#allocation2 + $0x18] sm:$0x7f]  ;;  %v505_v59 = vpop.permute.xlu1 %504  ;;  %v503_v60 = vpop.permute.xlu0 %502 }
  0xfa   : > { %v474_v57 = vadd.f32 %v464_v48, %v448_v55  ;;  %479 = vst.msk [vmem:[#allocation2 + $0x10] sm:$0xff] %vm403_vm3, %v475_v54  ;;  %v476_v58 = vadd.f32 %v468_v53, %v450_v56 }
  0xfc   : > { %478 = vst.msk [vmem:[#allocation2 + $0x8] sm:$0x7f] %vm405_vm4, %v474_v57  ;;  %480 = vst.msk [vmem:[#allocation2 + $0x18] sm:$0x7f] %vm405_vm4, %v476_v58 }
  0xfd   : > { %v509_v61 = vpop.permute.xlu1 %508  ;;  %v507_v62 = vpop.permute.xlu0 %506 }
 0x101   : > { %v540_v11 = vpop.permute.xlu1 %539  ;;  %v538_v12 = vpop.permute.xlu0 %537 }
 0x103   : > { %v495_v63 = vld [vmem:[#allocation2 + $0x9] sm:$0x7f]  ;;  %v494_v0 = vld [vmem:[#allocation2 + $0x1] sm:$0xff]  ;;  %v497_v1 = vld [vmem:[#allocation2 + $0x19] sm:$0x7f] }
 0x104   : > { %v515_v2 = vadd.f32 %v505_v59, %v495_v63  ;;  %v514_v3 = vadd.f32 %v503_v60, %v494_v0  ;;  %v517_v8 = vadd.f32 %v509_v61, %v497_v1  ;;  %v496_v9 = vld [vmem:[#allocation2 + $0x11] sm:$0xff] }
 0x105   : > { %v516_v10 = vadd.f32 %v507_v62, %v496_v9  ;;  %v544_v13 = vpop.permute.xlu1 %543  ;;  %v542_v14 = vpop.permute.xlu0 %541 }
 0x106   : > { %521 = vst.msk [vmem:[#allocation2 + $0x9] sm:$0x7f] %vm520_vm5, %v515_v2  ;;  %523 = vst.msk [vmem:[#allocation2 + $0x19] sm:$0x7f] %vm520_vm5, %v517_v8 }
 0x107   : > { %519 = vst.msk [vmem:[#allocation2 + $0x1] sm:$0xff] %vm518_vm6, %v514_v3  ;;  %522 = vst.msk [vmem:[#allocation2 + $0x11] sm:$0xff] %vm518_vm6, %v516_v10 }
 0x109   : > { %v579_v23 = vpop.permute.xlu1 %578  ;;  %v577_v24 = vpop.permute.xlu0 %576 }
 0x10d   : > { %v583_v7 = vpop.permute.xlu1 %582  ;;  %v581_v5 = vpop.permute.xlu0 %580 }
 0x10e   : > { %v530_v15 = vld [vmem:[#allocation2 + $0x8] sm:$0xff]  ;;  %v529_v16 = vld [vmem:[#allocation2] sm:$0xff]  ;;  %v532_v19 = vld [vmem:[#allocation2 + $0x18] sm:$0xff] }
 0x10f   : > { %v550_v17 = vadd.f32 %v540_v11, %v530_v15  ;;  %v549_v18 = vadd.f32 %v538_v12, %v529_v16  ;;  %v531_v20 = vld [vmem:[#allocation2 + $0x10] sm:$0xff]  ;;  %v552_v21 = vadd.f32 %v544_v13, %v532_v19  ;;  %v647_v16 = vstv %s644_s5 }
 0x110   : > { %v551_v22 = vadd.f32 %v542_v14, %v531_v20  ;;  %v654_v19 = vstv %s653_s7 }
 0x111   : > { %554 = vst.msk [vmem:[#allocation2 + $0x8] sm:$0xff] %vm518_vm6, %v550_v17  ;;  %553 = vst.msk [vmem:[#allocation2] sm:$0xff] %vm518_vm6, %v549_v18 }
 0x112   : > { %556 = vst.msk [vmem:[#allocation2 + $0x18] sm:$0xff] %vm518_vm6, %v552_v21  ;;  %555 = vst.msk [vmem:[#allocation2 + $0x10] sm:$0xff] %vm518_vm6, %v551_v22 }
 0x118   : > { %v563_v25 = vld [vmem:[#allocation2 + $0x8] sm:$0x7f]  ;;  %v562_v26 = vld [vmem:[#allocation2] sm:$0xff] }
 0x119   : > { %v589_v27 = vadd.f32 %v579_v23, %v563_v25  ;;  %v588_v28 = vadd.f32 %v577_v24, %v562_v26  ;;  %v565_v6 = vld [vmem:[#allocation2 + $0x18] sm:$0x7f]  ;;  %v564_v29 = vld [vmem:[#allocation2 + $0x10] sm:$0xff] }
 0x11a   : > { %v591_v4 = vadd.f32 %v583_v7, %v565_v6  ;;  %v590_v30 = vadd.f32 %v581_v5, %v564_v29 }
 0x11b   : > { %593 = vst.msk [vmem:[#allocation2 + $0x8] sm:$0x7f] %vm520_vm5, %v589_v27 }
 0x11c   : > { %592 = vst.msk [vmem:[#allocation2] sm:$0xff] %vm518_vm6, %v588_v28  ;;  %594 = vst.msk [vmem:[#allocation2 + $0x10] sm:$0xff] %vm518_vm6, %v590_v30 }
 0x11d   : > { %595 = vst.msk [vmem:[#allocation2 + $0x18] sm:$0x7f] %vm520_vm5, %v591_v4 }
 0x122   : > { %v597_v32 = vld [vmem:[#allocation2 + $0x8] sm:$0xff] }
 0x123   : > { %v596_v31 = vld [vmem:[#allocation2] sm:$0xff]  ;;  %v598_v33 = vld [vmem:[#allocation2 + $0x10] sm:$0xff]  ;;  %v601_v35 = vsel %vm311_vm0, %v597_v32, 0.0 }
 0x124   : > { %v600_v34 = vsel %vm311_vm0, %v596_v31, 0.0  ;;  %v599_v36 = vld [vmem:[#allocation2 + $0x18] sm:$0xff]  ;;  %v603_v38 = vsel %vm311_vm0, %v598_v33, 0.0 }
 0x125   : > { %v602_v37 = vadd.f32 %v601_v35, %v600_v34  ;;  %v605_v40 = vsel %vm311_vm0, %v599_v36, 0.0 }
 0x127   : > { %v604_v39 = vadd.f32 %v603_v38, %v602_v37 }
 0x129   : > { %v606_v41 = vadd.f32 %v605_v40, %v604_v39 }
 0x12b   : > { %607 = vadd.xlane.f32.xlu0 %v606_v41 }
 0x1b8   : > { %v608_v42 = vpop.xlane.xlu0 %607 }
 0x1b9   : > { %v609_v43 = vrot.slane %v608_v42, 4 }
 0x1bb   : > { %v610_v44 = vadd.f32 %v609_v43, %v608_v42 }
 0x1bd   : > { %v611_v45 = vrot.slane %v610_v44, 2 }
 0x1bf   : > { %v612_v46 = vadd.f32 %v611_v45, %v610_v44 }
 0x1c1   : > { %v613_v47 = vrot.slane %v612_v46, 1 }
 0x1c3   : > { %v614_v48 = vadd.f32 %v613_v47, %v612_v46 }
 0x1c5   : > { %835 = vpush %v614_v48 }
 0x1f6   : > { %s836_s14 = spop %835 }
 0x1f7   : > { %v616_v49 = vstv %s836_s14 }
 0x1f8   : > { %v617_v50 = vmul.f32 0.001953125, %v616_v49 }
 0x1fa   : > { %v618_v51 = vsub.f32 %v596_v31, %v617_v50  ;;  %v619_v52 = vsub.f32 %v597_v32, %v617_v50  ;;  %v620_v53 = vsub.f32 %v598_v33, %v617_v50  ;;  %v621_v54 = vsub.f32 %v599_v36, %v617_v50 }
 0x1fc   : > { %v622_v55 = vmul.f32 %v618_v51, %v618_v51  ;;  %v623_v56 = vmul.f32 %v619_v52, %v619_v52  ;;  %v624_v57 = vmul.f32 %v620_v53, %v620_v53  ;;  %v625_v58 = vmul.f32 %v621_v54, %v621_v54 }
 0x1fe   : > { %v626_v59 = vsel %vm311_vm0, %v622_v55, 0.0  ;;  %v627_v60 = vsel %vm311_vm0, %v623_v56, 0.0  ;;  %v629_v62 = vsel %vm311_vm0, %v624_v57, 0.0  ;;  %v631_v0 = vsel %vm311_vm0, %v625_v58, 0.0 }
 0x1ff   : > { %v628_v61 = vadd.f32 %v627_v60, %v626_v59 }
 0x201   : > { %v630_v63 = vadd.f32 %v629_v62, %v628_v61 }
 0x203   : > { %v632_v1 = vadd.f32 %v631_v0, %v630_v63 }
 0x205   : > { %633 = vadd.xlane.f32.xlu1 %v632_v1 }
 0x292   : > { %v634_v2 = vpop.xlane.xlu1 %633 }
 0x293   : > { %v635_v3 = vrot.slane %v634_v2, 4 }
 0x295   : > { %v636_v8 = vadd.f32 %v635_v3, %v634_v2 }
 0x297   : > { %v637_v9 = vrot.slane %v636_v8, 2 }
 0x299   : > { %v638_v10 = vadd.f32 %v637_v9, %v636_v8 }
 0x29b   : > { %v639_v11 = vrot.slane %v638_v10, 1 }
 0x29d   : > { %v640_v12 = vadd.f32 %v639_v11, %v638_v10 }
 0x29f   : > { %837 = vpush %v640_v12 }
 0x2d0   : > { %s838_s30 = spop %837 }
 0x2d1   : > { %v642_v13 = vstv %s838_s30 }
 0x2d2   : > { %v643_v14 = vmul.f32 0.001953125, %v642_v13 }
 0x2d4   : > { %v645_v15 = vadd.f32 1e-05, %v643_v14 }
 0x2d6   : > { %939 = vrsqrt.f32 %v645_v15 }
 0x2e0   : > { %v940_v17 = vpop.eup %939 }
 0x2e1   : > { %v648_v18 = vmul.f32 %v940_v17, %v647_v16 }
 0x2e3   : > { %v649_v20 = vmul.f32 %v648_v18, %v618_v51  ;;  %v650_v21 = vmul.f32 %v648_v18, %v619_v52  ;;  %v651_v22 = vmul.f32 %v648_v18, %v620_v53  ;;  %v652_v23 = vmul.f32 %v648_v18, %v621_v54 }
 0x2e5   : > { %v655_v24 = vadd.f32 %v654_v19, %v649_v20  ;;  %v656_v7 = vadd.f32 %v654_v19, %v650_v21  ;;  %v657_v5 = vadd.f32 %v654_v19, %v651_v22  ;;  %v658_v25 = vadd.f32 %v654_v19, %v652_v23 }
 0x2e7   : > { %659 = vst.msk [vmem:[%s279_s8] sm:$0xff] %vm311_vm0, %v655_v24  ;;  %660 = vst.msk [vmem:[%s279_s8 + $0x8] sm:$0xff] %vm311_vm0, %v656_v7 }
 0x2e8   : > { %661 = vst.msk [vmem:[%s279_s8 + $0x10] sm:$0xff] %vm311_vm0, %v657_v5  ;;  %662 = vst.msk [vmem:[%s279_s8 + $0x18] sm:$0xff] %vm311_vm0, %v658_v25 }
 0x2e9   : > { %s834_s11 = sshll.u32 %s1098_s19, 8  ;;  %s693_s12 = sshll.u32 %s279_s8, 4  ;;  %s694_s12 = int_to_ptr.vmem [resolvable:$true] %s693_s12 }
 0x2ea   : > { %s676_s23 = scalar_lea.hbm %s1394_s4, %s834_s11  ;;  %s1045_s26 = smov 256  }
 0x2eb   : > { %p1413_p8 = scmp.ne.s32.totalorder %s1402_s27, 0  ;;  %s1046_s29 = smov 1024  }
 0x2ec   : > { %s1047_s13 = smov 2   ;;  %s1048_s6 = smov 128  }
 0x2ed   : > { %860 = sst [smem:[#allocation15]] (%p1413_p8), %s1045_s26  ;;  %s1049_s19 = smov 8  }
 0x2ee   : > { %861 = sst [smem:[#allocation15 + $0x1]] (%p1413_p8), %s1046_s29  ;;  %s1050_s10 = smov [#allocation14]  }
 0x2ef   : > { %862 = sst [smem:[#allocation15 + $0x2]] (%p1413_p8), %s1047_s13  ;;  %s1051_s25 = smov 0  }
 0x2f0   : > { %863 = sst [smem:[#allocation15 + $0x3]] (%p1413_p8), %s1048_s6 }
 0x2f1   : > { %864 = sst [smem:[#allocation15 + $0x4]] (%p1413_p8), %s1048_s6 }
 0x2f2   : > { %865 = sst [smem:[#allocation15 + $0x5]] (%p1413_p8), %s1049_s19 }
 0x2f3   : > { %866 = dma.general (%p1413_p8), %s694_s12, 512, %s676_s23, %s664_s9, %s1050_s10, [#allocation15], %s1051_s25, 0  }
 0x2f4 PF: > { %p888_p12 = scmp.ge.s32.totalorder %s1032_s18, 2  ;;  %s721_s14 = sand.u32 1, %s1020_s15  }
 0x2f5   : > { %p1414_p11 = scmp.ne.s32.totalorder %s1403_s28, 0  ;;  %s722_s30 = scalar_lea.sflag [#allocation5], %s721_s14 }
 0x2f7   : > { %p879_p9 = pnand %p888_p12, %p1414_p11 }
 0x2f9   : > { %1015 = dma.done.wait (!%p879_p9), %s722_s30, 512  }
 0x2fa   : > { %1017 = vsyncadd (!%p879_p9), %s722_s30, 4294966784  ;;  %p19_p5 = scmp.ge.s32.totalorder %s1102_s21, 6   ;;  %s1415_s15 = smov %s1024_s16 }
 0x2fb   : > { %s1416_s16 = smov %s1028_s17  ;;  %s1417_s17 = smov %s1114_s24 }
 0x2fc   : > { %s1418_s18 = smov %s1102_s21  ;;  %21 = sbr.rel (!%p19_p5) target bundleno = 7 (0x7), region = 104 }
 0x303   :  { %727 = vsyncpa [#allocation4], 1 }
 0x304   :  { %729 = vsyncpa [#allocation4 + $0x1], 1 }
 0x305   :  { %730 = vsyncpa [#allocation5], 1 }
 0x306   :  { %732 = vsyncpa [#allocation5 + $0x1], 1 }
 0x307   :  { %733 = vsyncpa [#allocation6], 1 }
 0x308   :  { %735 = vsyncpa [#allocation6 + $0x1], 1 }
 0x309   :  { %736 = vsyncpa [#allocation9], 1 }

</bundles_post_ra>
